<compile_context>
chip_gen: v7x
topology: tpu7x:2x2x1
jax: 0.10.0
libtpu: 0.0.40
codegen_flags: <defaults>
</compile_context>

<pallas_src>
import functools
import math

import jax
import jax.numpy as jnp
from jax import lax
from jax.experimental import pallas as pl
from jax.experimental.pallas import tpu as pltpu


def _round_up(x, m):
    return (x + m - 1) // m * m


def _matmul_bias_kernel(x_ref, w_ref, b_ref, o_ref, *, precision):
    """One grid step: (tm, kpad) @ (kpad, cout_tile) on the MXU + f32 bias add.

    x_ref : (tm, kpad)        im2col patch tile (f32 or bf16)
    w_ref : (kpad, cout_tile) im2col weight tile (zero-padded rows/cols)
    b_ref : (1, cout_tile)    bias tile (f32, zero-padded)
    o_ref : (tm, cout_tile)   lane-dense output tile
    """
    acc = jnp.dot(x_ref[...], w_ref[...],
                  preferred_element_type=jnp.float32,
                  precision=precision)
    o_ref[...] = (acc + b_ref[...].astype(jnp.float32)).astype(o_ref.dtype)


def conv2d_same_padding_pallas(x, weight, bias, stride=(1, 1), padding=(0, 0),
                               dilation=(1, 1), groups=1, *, tile_m=256,
                               cout_tile=128, mxu_dtype=None, precision=None):
    """Replicates `conv2d_same_padding` from the PyTorch reference.

    x: (N, Cin, H, W) NCHW; weight: (Cout, Cin, KH, KW); bias: (Cout,)
    Returns (N, Cout, Hout, Wout) NCHW.

    mxu_dtype: set to jnp.bfloat16 on v6e/v7x for bf16 MXU operands
               (f32 accumulation is kept); None = f32 operands.
    precision: forwarded to jnp.dot; pass jax.lax.Precision.HIGHEST for exact
               f32 parity at large K (not needed at K ~ 40).
    """
    if tuple(stride) != (1, 1) or tuple(dilation) != (1, 1) or groups != 1:
        raise NotImplementedError(
            "conv2d_same_padding_pallas only lowers the reference module's "
            "defaults: stride=1, dilation=1, groups=1")
    # `padding` is ignored, exactly like the PyTorch reference.
    del padding

    n, cin, h, w = x.shape
    cout, _, kh, kw = weight.shape
    sh, dh = stride[0], dilation[0]

    # --- exact replication of the reference padding math (column padding is
    # intentionally derived from the ROW dims, as in the PyTorch code) ---
    out_rows = (h + sh - 1) // sh
    padding_rows = max(0, (out_rows - 1) * sh + (kh - 1) * dh + 1 - h)
    rows_odd = padding_rows % 2 != 0
    padding_cols = padding_rows
    cols_odd = rows_odd

    pad_top = padding_rows // 2
    pad_bottom = padding_rows // 2 + int(rows_odd)
    pad_left = padding_cols // 2
    pad_right = padding_cols // 2 + int(cols_odd)

    # --- wrapper-side layout glue ------------------------------------------
    # TODO(synk): if the surrounding model produces/consumes NHWC, these two
    # full-tensor transposes disappear.
    x_nhwc = jnp.transpose(x, (0, 2, 3, 1))
    xp = jnp.pad(x_nhwc, ((0, 0), (pad_top, pad_bottom),
                          (pad_left, pad_right), (0, 0)))
    hp, wp = xp.shape[1], xp.shape[2]
    hout = hp - kh + 1
    wout = wp - kw + 1

    # im2col unfold in the wrapper (lane-dense for tiny Cin; review item 3a).
    k_dim = kh * kw * cin
    taps = []
    for dy in range(kh):
        for dx in range(kw):
            taps.append(lax.slice(xp, (0, dy, dx, 0),
                                  (n, dy + hout, dx + wout, cin)))
    patches = jnp.stack(taps, axis=3).reshape(n * hout * wout, k_dim)

    # Pad: contraction dim to a multiple of 8 (sublane-aligned), M to the tile
    # size, Cout to a lane-dense multiple of cout_tile (unmasked 128-wide vst).
    kpad = _round_up(k_dim, 8)
    m_total = n * hout * wout
    tm = min(tile_m, _round_up(m_total, 8))
    m_pad = _round_up(m_total, tm)
    cout_pad = _round_up(max(cout, cout_tile), cout_tile)

    patches = jnp.pad(patches, ((0, m_pad - m_total), (0, kpad - k_dim)))

    # im2col weight: (Cout, Cin, KH, KW) -> (KH*KW*Cin, Cout), zero-padded.
    w_mat = jnp.transpose(weight, (2, 3, 1, 0)).reshape(k_dim, cout)
    w_mat = jnp.pad(w_mat, ((0, kpad - k_dim), (0, cout_pad - cout)))
    b_mat = jnp.pad(bias, (0, cout_pad - cout)).reshape(1, cout_pad).astype(jnp.float32)

    if mxu_dtype is not None:
        # v6e/v7x: bf16 MXU operands; accumulation and bias add stay f32.
        patches = patches.astype(mxu_dtype)
        w_mat = w_mat.astype(mxu_dtype)

    n_m = m_pad // tm
    n_co = cout_pad // cout_tile

    kernel = functools.partial(_matmul_bias_kernel, precision=precision)

    out_flat = pl.pallas_call(
        kernel,
        out_shape=jax.ShapeDtypeStruct((m_pad, cout_pad), x.dtype),
        grid_spec=pltpu.PrefetchScalarGridSpec(
            num_scalar_prefetch=0,
            grid=(n_m, n_co),
            in_specs=[
                pl.BlockSpec((tm, kpad), lambda i, j: (i, 0)),          # patches
                pl.BlockSpec((kpad, cout_tile), lambda i, j: (0, j)),   # weight
                pl.BlockSpec((1, cout_tile), lambda i, j: (0, j)),      # bias
            ],
            out_specs=pl.BlockSpec((tm, cout_tile), lambda i, j: (i, j)),
        ),
        compiler_params=pltpu.CompilerParams(
            dimension_semantics=("parallel", "parallel")),
    )(patches, w_mat, b_mat)

    out_nhwc = out_flat[:m_total, :cout].reshape(n, hout, wout, cout)
    return jnp.transpose(out_nhwc, (0, 3, 1, 2))  # back to NCHW


if __name__ == "__main__":
    # module config: Conv2d(in_channels=4, out_channels=8, kernel_size=3)
    N, CIN, H, W = 2, 4, 16, 16
    COUT, KH, KW = 8, 3, 3

    key = jax.random.PRNGKey(0)
    kx, kw_, kb = jax.random.split(key, 3)

    x = jax.random.normal(kx, (N, CIN, H, W), dtype=jnp.float32)

    # deterministic init matching kaiming_uniform_(a=sqrt(5)) + bias uniform:
    # both reduce to U(-1/sqrt(fan_in), 1/sqrt(fan_in)) with fan_in = CIN*KH*KW.
    fan_in = CIN * KH * KW
    bound = 1.0 / math.sqrt(fan_in)
    weight = jax.random.uniform(kw_, (COUT, CIN, KH, KW), jnp.float32,
                                minval=-bound, maxval=bound)
    bias = jax.random.uniform(kb, (COUT,), jnp.float32,
                              minval=-bound, maxval=bound)

    out = conv2d_same_padding_pallas(x, weight, bias,
                                     stride=(1, 1), padding=(1, 1),
                                     dilation=(1, 1), groups=1)
    out = jax.block_until_ready(out)

    # reference check against XLA's conv (same padding numbers: pad 1 each side)
    ref = jax.lax.conv_general_dilated(
        x, weight, window_strides=(1, 1),
        padding=((1, 1), (1, 1)),
        dimension_numbers=("NCHW", "OIHW", "NCHW"),
    ) + bias[None, :, None, None]

    assert out.shape == (N, COUT, H, W), out.shape
    assert jnp.allclose(out, ref, atol=1e-4, rtol=1e-4), \
        float(jnp.max(jnp.abs(out - ref)))

    print("KERNEL_OK")
</pallas_src>

<mosaic_0001>
module attributes {stable_mosaic.version = 11 : i64} {
  func.func @_matmul_bias_kernel(%arg0: i32, %arg1: i32, %arg2: memref<256x40xf32, #tpu.memory_space<vmem>>, %arg3: memref<40x128xf32, #tpu.memory_space<vmem>>, %arg4: memref<1x128xf32, #tpu.memory_space<vmem>>, %arg5: memref<256x128xf32, #tpu.memory_space<vmem>>) attributes {dimension_semantics = [#tpu.dimension_semantics<parallel>, #tpu.dimension_semantics<parallel>], iteration_bounds = array<i64: 2, 1>, scalar_prefetch = 0 : i64, scratch_operands = 0 : i64, tpu.core_type = #tpu.core_type<tc>, window_params = [{transform_indices = @transform_0, window_bounds = array<i64: 256, 40>}, {transform_indices = @transform_1, window_bounds = array<i64: 40, 128>}, {transform_indices = @transform_2, window_bounds = array<i64: 1, 128>}, {transform_indices = @transform_3, window_bounds = array<i64: 256, 128>}]} {
    %c0 = arith.constant 0 : index
    %c0_0 = arith.constant 0 : index
    %0 = vector.load %arg2[%c0, %c0_0] : memref<256x40xf32, #tpu.memory_space<vmem>>, vector<256x40xf32>
    %c0_1 = arith.constant 0 : index
    %c0_2 = arith.constant 0 : index
    %1 = vector.load %arg3[%c0_1, %c0_2] : memref<40x128xf32, #tpu.memory_space<vmem>>, vector<40x128xf32>
    %cst = arith.constant dense<0.000000e+00> : vector<256x128xf32>
    %2 = tpu.matmul %0, %1, %cst {dimension_numbers = #tpu.dot_dimension_numbers<[1], [0], [0], [1], [0, 0, 1, 1], [], []>} : vector<256x40xf32>, vector<40x128xf32>, vector<256x128xf32> -> vector<256x128xf32>
    %c0_3 = arith.constant 0 : index
    %c0_4 = arith.constant 0 : index
    %3 = vector.load %arg4[%c0_3, %c0_4] : memref<1x128xf32, #tpu.memory_space<vmem>>, vector<1x128xf32>
    %4 = vector.broadcast %3 : vector<1x128xf32> to vector<256x128xf32>
    %5 = arith.addf %2, %4 : vector<256x128xf32>
    %c0_5 = arith.constant 0 : index
    %c0_6 = arith.constant 0 : index
    %6 = vector.load %arg5[%c0_5, %c0_6] : memref<256x128xf32, #tpu.memory_space<vmem>>, vector<256x128xf32>
    tpu.vector_store %arg5[%c0_5, %c0_6], %5 {strides = array<i32>} : memref<256x128xf32, #tpu.memory_space<vmem>>, vector<256x128xf32>,
    return
  }
  func.func @transform_0(%arg0: i32, %arg1: i32) -> (i32, i32) {
    %c0_i32 = arith.constant 0 : i32
    %c0_i32_0 = arith.constant 0 : i32
    return %arg0, %c0_i32 : i32, i32
  }
  func.func @transform_1(%arg0: i32, %arg1: i32) -> (i32, i32) {
    %c0_i32 = arith.constant 0 : i32
    %c0_i32_0 = arith.constant 0 : i32
    return %c0_i32, %arg1 : i32, i32
  }
  func.func @transform_2(%arg0: i32, %arg1: i32) -> (i32, i32) {
    %c0_i32 = arith.constant 0 : i32
    %c0_i32_0 = arith.constant 0 : i32
    return %c0_i32, %arg1 : i32, i32
  }
  func.func @transform_3(%arg0: i32, %arg1: i32) -> (i32, i32) {
    %c0_i32 = arith.constant 0 : i32
    return %arg0, %arg1 : i32, i32
  }
}

</mosaic_0001>

<bundles_post_ra>
// kernel: tpu_custom_call.1
= control target key start
LH: loop header
LB: loop body
LE: loop exit
PB: predicated region body
PF: predicated region fallthrough
CT: control target
= control target key end

     0   :  { %8 = vsyncpa [#allocation3], 0  ;;  %s1318_s0 = inlined_call_operand.vmem [shape: f32[512,40], index: 0, kind: input, shape index: {}]   ;;  %s1319_s1 = inlined_call_operand.vmem [shape: f32[40,128], index: 1, kind: input, shape index: {}]   ;;  %s1320_s2 = inlined_call_operand.vmem [shape: f32[1,128], index: 2, kind: input, shape index: {}]   ;;  %s1321_s3 = inlined_call_operand.hbm [shape: f32[512,128], index: 3, kind: output, shape index: {}]  }
   0x1   :  { %10 = vsyncpa [#allocation3 + $0x1], 0  ;;  %s1047_s12 = smov 0   ;;  %s1049_s13 = smov 0  }
   0x2   :  { %s1051_s14 = smov 0   ;;  %s1053_s15 = smov 0  }
   0x3   :  { %s1055_s16 = smov 0   ;;  %s1057_s17 = smov 0  }
   0x4 LB: > { %s729_s18 = sadd.s32 4294967295, %s1022_s17   ;;  %s730_s19 = sadd.s32 4294967294, %s1022_s17   ;;  %s1022_s17 = sphi %s1057_s17, %s16_s17   ;;  %s1018_s16 = sphi %s1055_s16, %s1328_s16   ;;  %s1014_s15 = sphi %s1053_s15, %s1327_s15   ;;  %s1010_s14 = sphi %s1051_s14, %s1326_s14   ;;  %s1006_s13 = sphi %s1049_s13, %s1325_s13   ;;  %s1002_s12 = sphi %s1047_s12, %s1324_s12  }
   0x5   : > { %s28_s20 = sadd.s32 1, %s1018_s16  ;;  %s115_s21 = sadd.s32 1, %s1010_s14 }
   0x6   : > { %p30_p0 = scmp.ge.s32.totalorder %s28_s20, 2  ;;  %p125_p1 = scmp.ne.s32.totalorder %s1010_s14, %s1006_s13 }
   0x7   : > { %p126_p2 = scmp.eq.s32.totalorder %s729_s18, 1  ;;  %p131_p3 = scmp.ne.s32.totalorder %s1006_s13, %s1002_s12 }
   0x8   : > { %s1330_s20 = smov (%p30_p0, %s28_s20), 0  ;;  %p132_p5 = scmp.eq.s32.totalorder %s730_s19, 1 }
   0x9   : > { %p1087_p4 = por %p126_p2, %p125_p1  ;;  %s110_s23 = ssub.s32 %s1018_s16, %s1330_s20 }
   0xa   : > { %p735_p6 = scmp.ge.s32.totalorder %s1022_s17, 1  ;;  %p113_p7 = scmp.eq.s32.totalorder %s110_s23, 0 }
   0xb   : > { %p1094_p8 = por %p132_p5, %p131_p3  ;;  %p172_p9 = scmp.lt.s32.totalorder %s1022_s17, 3 }
   0xc   : > { %s1100_s25 = scalar_select %p113_p7, %s1010_s14, %s115_s21  }
   0xd   : > { %p173_p10 = pnand %p735_p6, %p172_p9 }
   0xe   : > { %v249_v0 = vld [vmem:[%s1319_s1] sm:$0xff] (!%p173_p10)  ;;  %v250_v1 = vld [vmem:[%s1319_s1 + $0x8] sm:$0xff] (!%p173_p10)  ;;  %v251_v2 = vld [vmem:[%s1319_s1 + $0x10] sm:$0xff] (!%p173_p10)  ;;  %s737_s5 = sshll.u32 (!%p173_p10), %s1014_s15, 5  ;;  %vm261_vm0 = vcmask (!%p173_p10), 326656   ;;  %s200_s21 = sand.u32 (!%p173_p10), 1, %s1006_s13  }
   0xf   : > { %176 = sbr.rel (%p173_p10) target bundleno = 286 (0x11e), region = 32  ;;  %v873_v3 = vpack.c.bf16 (!%p173_p10), %v250_v1, %v249_v0  ;;  %v252_v4 = vld [vmem:[%s1319_s1 + $0x18] sm:$0xff] (!%p173_p10)  ;;  %p204_p11 = scmp.lt.s32.totalorder (!%p173_p10), %s737_s5, 63  ;;  %v253_v6 = vld [vmem:[%s1319_s1 + $0x20] sm:$0xff] (!%p173_p10) }
  0x10   : > { %v877_v5 = vpack.c.bf16 (!%p173_p10), %v252_v4, %v251_v2  ;;  %s736_s23 = sshll.u32 (!%p173_p10), %s200_s21, 8  ;;  %v1193_v39 = vld [vmem:[%s1320_s2] ss:$0 sm:$0xff] (!%p173_p10)  ;;  %s777_s29 = sshll.u32 (!%p173_p10), %s1014_s15, 12 }
  0x11   : > { %874 = vmatprep.subr.bf16.mxu0 (!%p173_p10), %v873_v3  ;;  %881 = vmatprep.subr.bf16.mxu1 (!%p173_p10), %v873_v3  ;;  %s1199_s28 = scalar_lea.vmem (!%p173_p10), [#allocation2], %s736_s23  ;;  %s1272_s6 = scalar_lea.sflag (!%p173_p10), [#allocation3], %s200_s21 }
  0x12   : > { %876 = vmatpush3.bf16.msra.mxu0 (!%p173_p10), %v873_v3  ;;  %884 = vmatpush3.bf16.msra.mxu1 (!%p173_p10), %v873_v3  ;;  %s630_s30 = sshll.u32 (!%p173_p10), %s1199_s28, 4  ;;  %s1262_s30 = int_to_ptr.vmem [resolvable:$true] %s630_s30 }
  0x13   : > { %878 = vmatprep.subr.bf16.mxu0 (!%p173_p10), %v877_v5  ;;  %882 = vmatprep.subr.bf16.mxu1 (!%p173_p10), %v877_v5  ;;  %s944_s7 = scalar_lea.vmem (!%p173_p10), %s1262_s30, 4096 }
  0x14   : > { %p945_p12 = scmp.ne.s32.totalorder (!%p173_p10), %s1262_s30, %s944_s7 }
  0x16   : > { %s1332_s5 = smov (!%p204_p11, %s737_s5), 63  ;;  %880 = vmatpush3.bf16.msra.mxu0 %v877_v5  ;;  %885 = vmatpush3.bf16.msra.mxu1 %v877_v5  ;;  %p946_p13 = pnand %p945_p12, %p1087_p4 }
  0x17   : > { %s738_s8 = sshll.u32 %s1332_s5, 3  ;;  %823 = vmatprep.subr.mxu0 %v253_v6  ;;  %883 = vmatprep.subr.mxu1 %v253_v6  ;;  %s1260_s5 = scalar_lea.hbm %s1321_s3, %s777_s29 }
  0x18   : > { %s1121_s19 = scalar_lea.vmem %s1318_s0, %s738_s8  ;;  %p947_p0 = pneg %p946_p13 }
  0x19   : > { %v217_v7 = vld [vmem:[%s1121_s19] sm:$0xff]  ;;  %v218_v9 = vld [vmem:[%s1121_s19 + $0x8] sm:$0xff]  ;;  %v219_v11 = vld [vmem:[%s1121_s19 + $0x10] sm:$0xff]  ;;  %s1024_s8 = smov [#allocation2]  }
  0x1a   : > { %v233_v8 = vld [vmem:[%s1121_s19 + $0x80] sm:$0xff]  ;;  %825 = vmatprep.mubr.msk.f32.mxu0 %vm261_vm0, %v217_v7  ;;  %v234_v10 = vld [vmem:[%s1121_s19 + $0x88] sm:$0xff]  ;;  %v235_v12 = vld [vmem:[%s1121_s19 + $0x90] sm:$0xff]  ;;  %824 = vmatpush3.msra.mxu0 %v253_v6  ;;  %s948_s9 = sshll.u32 %s1024_s8, 4  ;;  %s949_s9 = int_to_ptr.vmem [resolvable:$false] %s948_s9 }
  0x1b   : > { %849 = vmatprep.mubr.msk.f32.mxu1 %vm261_vm0, %v233_v8  ;;  %886 = vmatpush3.msra.mxu1 %v253_v6  ;;  %v220_v13 = vld [vmem:[%s1121_s19 + $0x18] sm:$0xff]  ;;  %v221_v15 = vld [vmem:[%s1121_s19 + $0x20] sm:$0xff]  ;;  %v222_v17 = vld [vmem:[%s1121_s19 + $0x28] sm:$0xff]  ;;  %s950_s10 = scalar_lea.vmem %s949_s9, 8192  ;;  %p951_p1 = scmp.lt.s32.totalorder %s1262_s30, %s949_s9 }
  0x1c   : > { %826 = vmatmul.mubr.msk.f32.vlgmr.msra.gmra.mrb[0].mxu0 %vm261_vm0, %v218_v9  ;;  %850 = vmatmul.mubr.msk.f32.vlgmr.msra.gmra.mrb[0].mxu1 %vm261_vm0, %v234_v10  ;;  %v236_v14 = vld [vmem:[%s1121_s19 + $0x98] sm:$0xff]  ;;  %v237_v16 = vld [vmem:[%s1121_s19 + $0xa0] sm:$0xff]  ;;  %v238_v18 = vld [vmem:[%s1121_s19 + $0xa8] sm:$0xff]  ;;  %p952_p2 = scmp.lt.s32.totalorder %s950_s10, %s944_s7 }
  0x1d   : > { %828 = vmatprep.mubr.msk.f32.mxu0 %vm261_vm0, %v219_v11  ;;  %852 = vmatprep.mubr.msk.f32.mxu1 %vm261_vm0, %v235_v12  ;;  %v223_v19 = vld [vmem:[%s1121_s19 + $0x30] sm:$0xff]  ;;  %v224_v21 = vld [vmem:[%s1121_s19 + $0x38] sm:$0xff]  ;;  %v225_v23 = vld [vmem:[%s1121_s19 + $0x40] sm:$0xff] }
  0x1e   : > { %v239_v20 = vld [vmem:[%s1121_s19 + $0xb0] sm:$0xff]  ;;  %v240_v22 = vld [vmem:[%s1121_s19 + $0xb8] sm:$0xff]  ;;  %v241_v24 = vld [vmem:[%s1121_s19 + $0xc0] sm:$0xff]  ;;  %p953_p3 = por %p952_p2, %p951_p1 }
  0x1f   : > { %v226_v25 = vld [vmem:[%s1121_s19 + $0x48] sm:$0xff]  ;;  %v227_v27 = vld [vmem:[%s1121_s19 + $0x50] sm:$0xff]  ;;  %v228_v29 = vld [vmem:[%s1121_s19 + $0x58] sm:$0xff] }
  0x20   : > { %829 = vmatmul.mubr.msk.f32.gmra.mrb[2].mxu0 %vm261_vm0, %v220_v13  ;;  %853 = vmatmul.mubr.msk.f32.gmra.mrb[2].mxu1 %vm261_vm0, %v236_v14  ;;  %v242_v26 = vld [vmem:[%s1121_s19 + $0xc8] sm:$0xff]  ;;  %v243_v28 = vld [vmem:[%s1121_s19 + $0xd0] sm:$0xff]  ;;  %v244_v30 = vld [vmem:[%s1121_s19 + $0xd8] sm:$0xff]  ;;  %p954_p5 = pnand %p953_p3, %p947_p0 }
  0x21   : > { %831 = vmatprep.mubr.msk.f32.mxu0 %vm261_vm0, %v221_v15  ;;  %855 = vmatprep.mubr.msk.f32.mxu1 %vm261_vm0, %v237_v16  ;;  %v229_v31 = vld [vmem:[%s1121_s19 + $0x60] sm:$0xff]  ;;  %v230_v33 = vld [vmem:[%s1121_s19 + $0x68] sm:$0xff]  ;;  %v231_v35 = vld [vmem:[%s1121_s19 + $0x70] sm:$0xff] }
  0x22   : > { %v245_v32 = vld [vmem:[%s1121_s19 + $0xe0] sm:$0xff]  ;;  %v246_v34 = vld [vmem:[%s1121_s19 + $0xe8] sm:$0xff]  ;;  %v247_v36 = vld [vmem:[%s1121_s19 + $0xf0] sm:$0xff] }
  0x23   : > { %v232_v37 = vld [vmem:[%s1121_s19 + $0x78] sm:$0xff] }
  0x24   : > { %832 = vmatmul.mubr.msk.f32.gmra.mrb[4].mxu0 %vm261_vm0, %v222_v17  ;;  %856 = vmatmul.mubr.msk.f32.gmra.mrb[4].mxu1 %vm261_vm0, %v238_v18  ;;  %v248_v38 = vld [vmem:[%s1121_s19 + $0xf8] sm:$0xff] }
  0x25   : > { %834 = vmatprep.mubr.msk.f32.mxu0 %vm261_vm0, %v223_v19  ;;  %858 = vmatprep.mubr.msk.f32.mxu1 %vm261_vm0, %v239_v20 }
  0x28   : > { %835 = vmatmul.mubr.msk.f32.gmra.mrb[6].mxu0 %vm261_vm0, %v224_v21  ;;  %859 = vmatmul.mubr.msk.f32.gmra.mrb[6].mxu1 %vm261_vm0, %v240_v22 }
  0x29   : > { %837 = vmatprep.mubr.msk.f32.mxu0 %vm261_vm0, %v225_v23  ;;  %861 = vmatprep.mubr.msk.f32.mxu1 %vm261_vm0, %v241_v24 }
  0x2c   : > { %838 = vmatmul.mubr.msk.f32.gmra.mrb[8].mxu0 %vm261_vm0, %v226_v25  ;;  %862 = vmatmul.mubr.msk.f32.gmra.mrb[8].mxu1 %vm261_vm0, %v242_v26 }
  0x2d   : > { %840 = vmatprep.mubr.msk.f32.mxu0 %vm261_vm0, %v227_v27  ;;  %864 = vmatprep.mubr.msk.f32.mxu1 %vm261_vm0, %v243_v28 }
  0x30   : > { %841 = vmatmul.mubr.msk.f32.gmra.mrb[10].mxu0 %vm261_vm0, %v228_v29  ;;  %865 = vmatmul.mubr.msk.f32.gmra.mrb[10].mxu1 %vm261_vm0, %v244_v30 }
  0x31   : > { %843 = vmatprep.mubr.msk.f32.mxu0 %vm261_vm0, %v229_v31  ;;  %867 = vmatprep.mubr.msk.f32.mxu1 %vm261_vm0, %v245_v32 }
  0x34   : > { %844 = vmatmul.mubr.msk.f32.gmra.mrb[12].mxu0 %vm261_vm0, %v230_v33  ;;  %868 = vmatmul.mubr.msk.f32.gmra.mrb[12].mxu1 %vm261_vm0, %v246_v34 }
  0x35   : > { %846 = vmatprep.mubr.msk.f32.mxu0 %vm261_vm0, %v231_v35  ;;  %870 = vmatprep.mubr.msk.f32.mxu1 %vm261_vm0, %v247_v36 }
  0x38   : > { %847 = vmatmul.mubr.msk.f32.gmra.mrb[14].mxu0 %vm261_vm0, %v232_v37  ;;  %871 = vmatmul.mubr.msk.f32.gmra.mrb[14].mxu1 %vm261_vm0, %v248_v38 }
  0xef   : > { %v827_v40 = vpop.f32.mrb[0].mxu0  ;;  %v851_v41 = vpop.f32.mrb[0].mxu1 }
  0xf0   : > { %v430_v42 = vadd.f32 %v827_v40, %v1193_v39  ;;  %v510_v43 = vadd.f32 %v851_v41, %v1193_v39  ;;  %v424_v44 = vpop.f32.mrb[1].mxu0  ;;  %v504_v45 = vpop.f32.mrb[1].mxu1 }
  0xf1   : > { %v425_v46 = vadd.f32 %v1193_v39, %v424_v44  ;;  %v505_v47 = vadd.f32 %v1193_v39, %v504_v45 }
  0xf2   : > { %584 = vst [vmem:[%s1199_s28 + $0x8] sm:$0xff] %v430_v42  ;;  %600 = vst [vmem:[%s1199_s28 + $0x88] sm:$0xff] %v510_v43 }
  0xf3   : > { %583 = vst [vmem:[%s1199_s28] sm:$0xff] %v425_v46  ;;  %599 = vst [vmem:[%s1199_s28 + $0x80] sm:$0xff] %v505_v47  ;;  %v830_v48 = vpop.f32.mrb[2].mxu0  ;;  %v854_v49 = vpop.f32.mrb[2].mxu1 }
  0xf4   : > { %v440_v50 = vadd.f32 %v830_v48, %v1193_v39  ;;  %v520_v51 = vadd.f32 %v854_v49, %v1193_v39  ;;  %v434_v52 = vpop.f32.mrb[3].mxu0  ;;  %v514_v53 = vpop.f32.mrb[3].mxu1 }
  0xf5   : > { %v435_v54 = vadd.f32 %v1193_v39, %v434_v52  ;;  %v515_v55 = vadd.f32 %v1193_v39, %v514_v53 }
  0xf6   : > { %586 = vst [vmem:[%s1199_s28 + $0x18] sm:$0xff] %v440_v50  ;;  %602 = vst [vmem:[%s1199_s28 + $0x98] sm:$0xff] %v520_v51 }
  0xf7   : > { %585 = vst [vmem:[%s1199_s28 + $0x10] sm:$0xff] %v435_v54  ;;  %601 = vst [vmem:[%s1199_s28 + $0x90] sm:$0xff] %v515_v55  ;;  %v833_v56 = vpop.f32.mrb[4].mxu0  ;;  %v857_v57 = vpop.f32.mrb[4].mxu1 }
  0xf8   : > { %v450_v58 = vadd.f32 %v833_v56, %v1193_v39  ;;  %v530_v59 = vadd.f32 %v857_v57, %v1193_v39  ;;  %v444_v60 = vpop.f32.mrb[5].mxu0  ;;  %v524_v61 = vpop.f32.mrb[5].mxu1 }
  0xf9   : > { %v445_v62 = vadd.f32 %v1193_v39, %v444_v60  ;;  %v525_v63 = vadd.f32 %v1193_v39, %v524_v61 }
  0xfa   : > { %588 = vst [vmem:[%s1199_s28 + $0x28] sm:$0xff] %v450_v58  ;;  %604 = vst [vmem:[%s1199_s28 + $0xa8] sm:$0xff] %v530_v59 }
  0xfb   : > { %587 = vst [vmem:[%s1199_s28 + $0x20] sm:$0xff] %v445_v62  ;;  %603 = vst [vmem:[%s1199_s28 + $0xa0] sm:$0xff] %v525_v63  ;;  %v836_v0 = vpop.f32.mrb[6].mxu0  ;;  %v860_v1 = vpop.f32.mrb[6].mxu1 }
  0xfc   : > { %v460_v2 = vadd.f32 %v836_v0, %v1193_v39  ;;  %v540_v3 = vadd.f32 %v860_v1, %v1193_v39  ;;  %v454_v4 = vpop.f32.mrb[7].mxu0  ;;  %v534_v5 = vpop.f32.mrb[7].mxu1 }
  0xfd   : > { %v455_v6 = vadd.f32 %v1193_v39, %v454_v4  ;;  %v535_v7 = vadd.f32 %v1193_v39, %v534_v5 }
  0xfe   : > { %590 = vst [vmem:[%s1199_s28 + $0x38] sm:$0xff] %v460_v2  ;;  %606 = vst [vmem:[%s1199_s28 + $0xb8] sm:$0xff] %v540_v3 }
  0xff   : > { %589 = vst [vmem:[%s1199_s28 + $0x30] sm:$0xff] %v455_v6  ;;  %605 = vst [vmem:[%s1199_s28 + $0xb0] sm:$0xff] %v535_v7  ;;  %v839_v8 = vpop.f32.mrb[8].mxu0  ;;  %v863_v9 = vpop.f32.mrb[8].mxu1 }
 0x100   : > { %v470_v10 = vadd.f32 %v839_v8, %v1193_v39  ;;  %v550_v11 = vadd.f32 %v863_v9, %v1193_v39  ;;  %v464_v12 = vpop.f32.mrb[9].mxu0  ;;  %v544_v13 = vpop.f32.mrb[9].mxu1 }
 0x101   : > { %v465_v14 = vadd.f32 %v1193_v39, %v464_v12  ;;  %v545_v15 = vadd.f32 %v1193_v39, %v544_v13 }
 0x102   : > { %592 = vst [vmem:[%s1199_s28 + $0x48] sm:$0xff] %v470_v10  ;;  %608 = vst [vmem:[%s1199_s28 + $0xc8] sm:$0xff] %v550_v11 }
 0x103   : > { %591 = vst [vmem:[%s1199_s28 + $0x40] sm:$0xff] %v465_v14  ;;  %607 = vst [vmem:[%s1199_s28 + $0xc0] sm:$0xff] %v545_v15  ;;  %v842_v16 = vpop.f32.mrb[10].mxu0  ;;  %v866_v17 = vpop.f32.mrb[10].mxu1 }
 0x104   : > { %v480_v18 = vadd.f32 %v842_v16, %v1193_v39  ;;  %v560_v19 = vadd.f32 %v866_v17, %v1193_v39  ;;  %v474_v20 = vpop.f32.mrb[11].mxu0  ;;  %v554_v21 = vpop.f32.mrb[11].mxu1 }
 0x105   : > { %v475_v22 = vadd.f32 %v1193_v39, %v474_v20  ;;  %v555_v23 = vadd.f32 %v1193_v39, %v554_v21 }
 0x106   : > { %594 = vst [vmem:[%s1199_s28 + $0x58] sm:$0xff] %v480_v18  ;;  %610 = vst [vmem:[%s1199_s28 + $0xd8] sm:$0xff] %v560_v19 }
 0x107   : > { %593 = vst [vmem:[%s1199_s28 + $0x50] sm:$0xff] %v475_v22  ;;  %609 = vst [vmem:[%s1199_s28 + $0xd0] sm:$0xff] %v555_v23  ;;  %v845_v24 = vpop.f32.mrb[12].mxu0  ;;  %v869_v25 = vpop.f32.mrb[12].mxu1 }
 0x108   : > { %v490_v26 = vadd.f32 %v845_v24, %v1193_v39  ;;  %v570_v27 = vadd.f32 %v869_v25, %v1193_v39  ;;  %v484_v28 = vpop.f32.mrb[13].mxu0  ;;  %v564_v29 = vpop.f32.mrb[13].mxu1 }
 0x109   : > { %v485_v30 = vadd.f32 %v1193_v39, %v484_v28  ;;  %v565_v31 = vadd.f32 %v1193_v39, %v564_v29 }
 0x10a   : > { %596 = vst [vmem:[%s1199_s28 + $0x68] sm:$0xff] %v490_v26  ;;  %612 = vst [vmem:[%s1199_s28 + $0xe8] sm:$0xff] %v570_v27 }
 0x10b   : > { %595 = vst [vmem:[%s1199_s28 + $0x60] sm:$0xff] %v485_v30  ;;  %611 = vst [vmem:[%s1199_s28 + $0xe0] sm:$0xff] %v565_v31  ;;  %v848_v32 = vpop.f32.mrb[14].mxu0  ;;  %v872_v33 = vpop.f32.mrb[14].mxu1 }
 0x10c   : > { %v500_v34 = vadd.f32 %v848_v32, %v1193_v39  ;;  %v580_v35 = vadd.f32 %v872_v33, %v1193_v39  ;;  %v494_v36 = vpop.f32.mrb[15].mxu0  ;;  %v574_v37 = vpop.f32.mrb[15].mxu1 }
 0x10d   : > { %v495_v38 = vadd.f32 %v1193_v39, %v494_v36  ;;  %v575_v40 = vadd.f32 %v1193_v39, %v574_v37 }
 0x10e   : > { %598 = vst [vmem:[%s1199_s28 + $0x78] sm:$0xff] %v500_v34  ;;  %614 = vst [vmem:[%s1199_s28 + $0xf8] sm:$0xff] %v580_v35 }
 0x10f   : > { %597 = vst [vmem:[%s1199_s28 + $0x70] sm:$0xff] %v495_v38  ;;  %613 = vst [vmem:[%s1199_s28 + $0xf0] sm:$0xff] %v575_v40 }
 0x110   : > { %957 = shalt.err (!%p954_p5)
}
 0x111   : > { %s958_s11 = scalar_lea.hbm %s1260_s5, 4096  ;;  %s962_s21 = scalar_lea.hbm %s1321_s3, 8192 }
 0x112   : > { %p959_p6 = scmp.ne.s32.totalorder %s1260_s5, %s958_s11  ;;  %p963_p10 = scmp.lt.u32.totalorder %s1260_s5, %s1321_s3 }
 0x113   : > { %p964_p11 = scmp.lt.u32.totalorder %s962_s21, %s958_s11  ;;  %p966_p13 = scmp.lt.u32.totalorder %s958_s11, %s1260_s5 }
 0x114   : > { %p960_p7 = pnand %p959_p6, %p1087_p4 }
 0x115   : > { %p965_p12 = por %p964_p11, %p963_p10 }
 0x116   : > { %p961_p9 = pneg %p960_p7 }
 0x117   : > { %p967_p0 = por %p966_p13, %p965_p12 }
 0x119   : > { %p968_p1 = pnand %p967_p0, %p961_p9 }
 0x11b   : > { %971 = shalt.err (!%p968_p1)
}
 0x11c   : > { %s1025_s27 = smov 128   ;;  %s1026_s28 = smov 8  }
 0x11d   : > { %887 = dma.vmem_to_hbm [thread:$0]  (%p1087_p4), %s1262_s30, 4096, %s1260_s5, %s1272_s6, %s1025_s27, %s1025_s27, %s1026_s28  }
 0x11e PF: > { %p893_p2 = scmp.ge.s32.totalorder %s1022_s17, 2  ;;  %s645_s29 = sand.u32 1, %s1002_s12  }
 0x11f   : > { %s646_s15 = scalar_lea.sflag [#allocation3], %s645_s29 }
 0x120   : > { %p890_p3 = pnand %p893_p2, %p1094_p8 }
 0x122   : > { %997 = dma.done.wait (!%p890_p3), %s646_s15, 4096  }
 0x123   : > { %999 = vsyncadd (!%p890_p3), %s646_s15, 4294963200  ;;  %s16_s17 = sadd.s32 1, %s1022_s17   ;;  %s1324_s12 = smov %s1006_s13 }
 0x124   : > { %p13_p5 = scmp.ge.s32.totalorder %s16_s17, 4   ;;  %s1325_s13 = smov %s1010_s14 }
 0x125   : > { %s1326_s14 = smov %s1100_s25  ;;  %s1327_s15 = smov %s1018_s16 }
 0x126   : > { %s1328_s16 = smov %s1330_s20  ;;  %15 = sbr.rel (!%p13_p5) target bundleno = 4 (0x4), region = 73 }
 0x12d   :  { %651 = vsyncpa [#allocation3], 1 }
 0x12e   :  { %653 = vsyncpa [#allocation3 + $0x1], 1 }

</bundles_post_ra>
